<compile_context>
chip_gen: v7x
topology: tpu7x:2x2x1
jax: 0.10.0
libtpu: 0.0.40
codegen_flags: <defaults>
</compile_context>

<pallas_src>
import functools

import jax
import jax.numpy as jnp
from jax.experimental import pallas as pl
from jax.experimental.pallas import tpu as pltpu

OUT_PAD = 128        # lane-dense padded output width
NEG_BIG = -1e30      # bias value for padded logit columns (exp -> 0 under softmax)


def _round_up(n, m):
    return ((n + m - 1) // m) * m


def mlp_kernel(x_ref, w1_ref, b1_ref, w2_ref, b2_ref, w3_ref, b3_ref, o_ref):
    x = x_ref[...]
    cd = w1_ref.dtype  # MXU operand dtype (f32 or bf16); accumulation is always f32.

    # l1 + ReLU
    h1 = jnp.dot(x.astype(cd), w1_ref[...],
                 preferred_element_type=jnp.float32) + b1_ref[...]
    h1 = jnp.maximum(h1, 0.0)

    # l2 + ReLU
    h2 = jnp.dot(h1.astype(cd), w2_ref[...],
                 preferred_element_type=jnp.float32) + b2_ref[...]
    h2 = jnp.maximum(h2, 0.0)

    # l3 (output columns padded to 128; pad columns carry -1e30 bias)
    logits = jnp.dot(h2.astype(cd), w3_ref[...],
                     preferred_element_type=jnp.float32) + b3_ref[...]

    # Numerically-stable softmax over the feature (last) axis; padded columns -> exp 0.
    m = jnp.max(logits, axis=-1, keepdims=True)
    e = jnp.exp(logits - m)
    s = jnp.sum(e, axis=-1, keepdims=True)
    o_ref[...] = (e * pl.reciprocal(s, approx=True)).astype(o_ref.dtype)


def mlp_forward(x, params, *, tb=None, vmem_limit_bytes=None):
    """x: (B, 784) f32. params: (w1, b1, w2, b2, w3, b3); weights may be f32 or bf16."""
    w1, b1, w2, b2, w3, b3 = params
    B, in_dim = x.shape
    out_dim = w3.shape[1]

    # Lane-pad the 10-wide head to 128 output columns (unmasked full-width stores).
    w3p = jnp.pad(w3, ((0, 0), (0, OUT_PAD - out_dim)))
    b3p = jnp.pad(b3, ((0, 0), (0, OUT_PAD - out_dim)), constant_values=NEG_BIG)

    # Batch tile: multiple of 8 (sublane); default 256 to fill the MXU on v6e/v7x
    # (>=128 also fills v5e's 4x128^2 MXU). Pad B up to a multiple of the tile.
    if tb is None:
        tb = min(256, _round_up(B, 8))
    tb = _round_up(tb, 8)
    Bp = _round_up(B, tb)
    if Bp != B:
        x = jnp.pad(x, ((0, Bp - B), (0, 0)))

    grid = (Bp // tb,)
    # Weights/biases: constant block index -> DMA'd once, resident across grid steps.
    const = lambda a: pl.BlockSpec(a.shape, lambda i: (0,) * a.ndim)

    out = pl.pallas_call(
        mlp_kernel,
        out_shape=jax.ShapeDtypeStruct((Bp, OUT_PAD), jnp.float32),
        grid=grid,
        in_specs=[
            pl.BlockSpec((tb, in_dim), lambda i: (i, 0)),   # x: batch-tiled
            const(w1), const(b1),
            const(w2), const(b2),
            const(w3p), const(b3p),
        ],
        out_specs=pl.BlockSpec((tb, OUT_PAD), lambda i: (i, 0)),
        compiler_params=pltpu.CompilerParams(
            dimension_semantics=("parallel",),
            vmem_limit_bytes=vmem_limit_bytes,
        ),
    )(x, w1, b1, w2, b2, w3p, b3p)

    return out[:B, :out_dim]


def init_params(key):
    """Deterministic init mimicking PyTorch's default nn.Linear init:
    U(-1/sqrt(fan_in), 1/sqrt(fan_in)) for both weight and bias."""
    sizes = [(784, 128), (128, 64), (64, 10)]
    params = []
    for i, (fan_in, fan_out) in enumerate(sizes):
        kw, kb = jax.random.split(jax.random.fold_in(key, i))
        bound = 1.0 / jnp.sqrt(jnp.float32(fan_in))
        w = jax.random.uniform(kw, (fan_in, fan_out), jnp.float32, -bound, bound)
        b = jax.random.uniform(kb, (1, fan_out), jnp.float32, -bound, bound)
        params += [w, b]
    return tuple(params)


def cast_weights_bf16(params):
    """bf16 weights (halves dominant w1 DMA, fast MXU path); biases stay f32."""
    w1, b1, w2, b2, w3, b3 = params
    return (w1.astype(jnp.bfloat16), b1,
            w2.astype(jnp.bfloat16), b2,
            w3.astype(jnp.bfloat16), b3)


def reference_forward(x, params):
    w1, b1, w2, b2, w3, b3 = params
    h1 = jnp.maximum(x @ w1 + b1, 0.0)
    h2 = jnp.maximum(h1 @ w2 + b2, 0.0)
    logits = h2 @ w3 + b3
    return jax.nn.softmax(logits, axis=1)


if __name__ == "__main__":
    key = jax.random.PRNGKey(0)
    kx, kp = jax.random.split(key)
    params = init_params(kp)

    # --- small batch (matches the module's intended tiny-test shape) ---
    x_small = jax.random.normal(kx, (8, 784), jnp.float32)
    out_small = jax.block_until_ready(mlp_forward(x_small, params))
    ref_small = reference_forward(x_small, params)
    assert out_small.shape == (8, 10)
    assert jnp.allclose(out_small, ref_small, atol=2e-3, rtol=2e-3)
    assert jnp.allclose(jnp.sum(out_small, axis=1), 1.0, atol=1e-2)

    # --- batch-tiled path with a real grid (tb=256, grid of 2 steps) ---
    x_big = jax.random.normal(jax.random.fold_in(kx, 1), (512, 784), jnp.float32)
    out_big = jax.block_until_ready(mlp_forward(x_big, params, tb=256))
    ref_big = reference_forward(x_big, params)
    assert out_big.shape == (512, 10)
    assert jnp.allclose(out_big, ref_big, atol=2e-3, rtol=2e-3)

    # --- bf16-weight path (v6e/v7x fast MXU + halved weight DMA), f32 accumulate ---
    params_bf16 = cast_weights_bf16(params)
    out_bf16 = jax.block_until_ready(mlp_forward(x_big, params_bf16, tb=256))
    ref_bf16 = reference_forward(
        x_big, tuple(p.astype(jnp.float32) for p in params_bf16))
    assert out_bf16.shape == (512, 10)
    assert jnp.allclose(out_bf16, ref_bf16, atol=2e-2, rtol=2e-2)
    assert jnp.allclose(jnp.sum(out_bf16, axis=1), 1.0, atol=1e-2)

    print("KERNEL_OK")
</pallas_src>

<mosaic_0001>
module attributes {stable_mosaic.version = 11 : i64} {
  func.func @mlp_kernel(%arg0: i32, %arg1: memref<8x784xf32, #tpu.memory_space<vmem>>, %arg2: memref<784x128xf32, #tpu.memory_space<vmem>>, %arg3: memref<1x128xf32, #tpu.memory_space<vmem>>, %arg4: memref<128x64xf32, #tpu.memory_space<vmem>>, %arg5: memref<1x64xf32, #tpu.memory_space<vmem>>, %arg6: memref<64x128xf32, #tpu.memory_space<vmem>>, %arg7: memref<1x128xf32, #tpu.memory_space<vmem>>, %arg8: memref<8x128xf32, #tpu.memory_space<vmem>>) attributes {dimension_semantics = [#tpu.dimension_semantics<parallel>], iteration_bounds = array<i64: 1>, scalar_prefetch = 0 : i64, scratch_operands = 0 : i64, tpu.core_type = #tpu.core_type<tc>, window_params = [{transform_indices = @transform_0, window_bounds = array<i64: 8, 784>}, {pipeline_mode = #tpu.pipeline_mode<synchronous>, transform_indices = @transform_1, window_bounds = array<i64: 784, 128>}, {pipeline_mode = #tpu.pipeline_mode<synchronous>, transform_indices = @transform_2, window_bounds = array<i64: 1, 128>}, {pipeline_mode = #tpu.pipeline_mode<synchronous>, transform_indices = @transform_3, window_bounds = array<i64: 128, 64>}, {pipeline_mode = #tpu.pipeline_mode<synchronous>, transform_indices = @transform_4, window_bounds = array<i64: 1, 64>}, {pipeline_mode = #tpu.pipeline_mode<synchronous>, transform_indices = @transform_5, window_bounds = array<i64: 64, 128>}, {pipeline_mode = #tpu.pipeline_mode<synchronous>, transform_indices = @transform_6, window_bounds = array<i64: 1, 128>}, {transform_indices = @transform_7, window_bounds = array<i64: 8, 128>}]} {
    %c0 = arith.constant 0 : index
    %c0_0 = arith.constant 0 : index
    %0 = vector.load %arg1[%c0, %c0_0] : memref<8x784xf32, #tpu.memory_space<vmem>>, vector<8x784xf32>
    %c0_1 = arith.constant 0 : index
    %c0_2 = arith.constant 0 : index
    %1 = vector.load %arg2[%c0_1, %c0_2] : memref<784x128xf32, #tpu.memory_space<vmem>>, vector<784x128xf32>
    %cst = arith.constant dense<0.000000e+00> : vector<8x128xf32>
    %2 = tpu.matmul %0, %1, %cst {dimension_numbers = #tpu.dot_dimension_numbers<[1], [0], [0], [1], [0, 0, 1, 1], [], []>} : vector<8x784xf32>, vector<784x128xf32>, vector<8x128xf32> -> vector<8x128xf32>
    %c0_3 = arith.constant 0 : index
    %c0_4 = arith.constant 0 : index
    %3 = vector.load %arg3[%c0_3, %c0_4] : memref<1x128xf32, #tpu.memory_space<vmem>>, vector<1x128xf32>
    %4 = vector.broadcast %3 : vector<1x128xf32> to vector<8x128xf32>
    %5 = arith.addf %2, %4 : vector<8x128xf32>
    %cst_5 = arith.constant 0.000000e+00 : f32
    %6 = vector.broadcast %cst_5 : f32 to vector<8x128xf32>
    %7 = arith.maximumf %5, %6 : vector<8x128xf32>
    %c0_6 = arith.constant 0 : index
    %c0_7 = arith.constant 0 : index
    %8 = vector.load %arg4[%c0_6, %c0_7] : memref<128x64xf32, #tpu.memory_space<vmem>>, vector<128x64xf32>
    %cst_8 = arith.constant dense<0.000000e+00> : vector<8x64xf32>
    %9 = tpu.matmul %7, %8, %cst_8 {dimension_numbers = #tpu.dot_dimension_numbers<[1], [0], [0], [1], [0, 0, 1, 1], [], []>} : vector<8x128xf32>, vector<128x64xf32>, vector<8x64xf32> -> vector<8x64xf32>
    %c0_9 = arith.constant 0 : index
    %c0_10 = arith.constant 0 : index
    %10 = vector.load %arg5[%c0_9, %c0_10] : memref<1x64xf32, #tpu.memory_space<vmem>>, vector<1x64xf32>
    %11 = vector.broadcast %10 : vector<1x64xf32> to vector<8x64xf32>
    %12 = arith.addf %9, %11 : vector<8x64xf32>
    %cst_11 = arith.constant 0.000000e+00 : f32
    %13 = vector.broadcast %cst_11 : f32 to vector<8x64xf32>
    %14 = arith.maximumf %12, %13 : vector<8x64xf32>
    %c0_12 = arith.constant 0 : index
    %c0_13 = arith.constant 0 : index
    %15 = vector.load %arg6[%c0_12, %c0_13] : memref<64x128xf32, #tpu.memory_space<vmem>>, vector<64x128xf32>
    %cst_14 = arith.constant dense<0.000000e+00> : vector<8x128xf32>
    %16 = tpu.matmul %14, %15, %cst_14 {dimension_numbers = #tpu.dot_dimension_numbers<[1], [0], [0], [1], [0, 0, 1, 1], [], []>} : vector<8x64xf32>, vector<64x128xf32>, vector<8x128xf32> -> vector<8x128xf32>
    %c0_15 = arith.constant 0 : index
    %c0_16 = arith.constant 0 : index
    %17 = vector.load %arg7[%c0_15, %c0_16] : memref<1x128xf32, #tpu.memory_space<vmem>>, vector<1x128xf32>
    %18 = vector.broadcast %17 : vector<1x128xf32> to vector<8x128xf32>
    %19 = arith.addf %16, %18 : vector<8x128xf32>
    %cst_17 = arith.constant dense<0xFF800000> : vector<8xf32>
    %20 = vector.multi_reduction <maximumf>, %19, %cst_17 [1] : vector<8x128xf32> to vector<8xf32>
    %21 = vector.shape_cast %20 : vector<8xf32> to vector<8x1xf32>
    %22 = vector.broadcast %21 : vector<8x1xf32> to vector<8x128xf32>
    %23 = arith.subf %19, %22 : vector<8x128xf32>
    %24 = math.exp %23 : vector<8x128xf32>
    %cst_18 = arith.constant dense<0.000000e+00> : vector<8xf32>
    %25 = vector.multi_reduction <add>, %24, %cst_18 [1] : vector<8x128xf32> to vector<8xf32>
    %26 = vector.shape_cast %25 : vector<8xf32> to vector<8x1xf32>
    %27 = tpu.reciprocal %26 {approx = true} : vector<8x1xf32> -> vector<8x1xf32>
    %28 = vector.broadcast %27 : vector<8x1xf32> to vector<8x128xf32>
    %29 = arith.mulf %24, %28 : vector<8x128xf32>
    %c0_19 = arith.constant 0 : index
    %c0_20 = arith.constant 0 : index
    %30 = vector.load %arg8[%c0_19, %c0_20] : memref<8x128xf32, #tpu.memory_space<vmem>>, vector<8x128xf32>
    tpu.vector_store %arg8[%c0_19, %c0_20], %29 {strides = array<i32>} : memref<8x128xf32, #tpu.memory_space<vmem>>, vector<8x128xf32>,
    return
  }
  func.func @transform_0(%arg0: i32) -> (i32, i32) {
    %c0_i32 = arith.constant 0 : i32
    %c0_i32_0 = arith.constant 0 : i32
    return %arg0, %c0_i32 : i32, i32
  }
  func.func @transform_1(%arg0: i32) -> (i32, i32) {
    %c0_i32 = arith.constant 0 : i32
    %c0_i32_0 = arith.constant 0 : i32
    %c0_i32_1 = arith.constant 0 : i32
    return %c0_i32, %c0_i32_0 : i32, i32
  }
  func.func @transform_2(%arg0: i32) -> (i32, i32) {
    %c0_i32 = arith.constant 0 : i32
    %c0_i32_0 = arith.constant 0 : i32
    %c0_i32_1 = arith.constant 0 : i32
    return %c0_i32, %c0_i32_0 : i32, i32
  }
  func.func @transform_3(%arg0: i32) -> (i32, i32) {
    %c0_i32 = arith.constant 0 : i32
    %c0_i32_0 = arith.constant 0 : i32
    %c0_i32_1 = arith.constant 0 : i32
    return %c0_i32, %c0_i32_0 : i32, i32
  }
  func.func @transform_4(%arg0: i32) -> (i32, i32) {
    %c0_i32 = arith.constant 0 : i32
    %c0_i32_0 = arith.constant 0 : i32
    %c0_i32_1 = arith.constant 0 : i32
    return %c0_i32, %c0_i32_0 : i32, i32
  }
  func.func @transform_5(%arg0: i32) -> (i32, i32) {
    %c0_i32 = arith.constant 0 : i32
    %c0_i32_0 = arith.constant 0 : i32
    %c0_i32_1 = arith.constant 0 : i32
    return %c0_i32, %c0_i32_0 : i32, i32
  }
  func.func @transform_6(%arg0: i32) -> (i32, i32) {
    %c0_i32 = arith.constant 0 : i32
    %c0_i32_0 = arith.constant 0 : i32
    %c0_i32_1 = arith.constant 0 : i32
    return %c0_i32, %c0_i32_0 : i32, i32
  }
  func.func @transform_7(%arg0: i32) -> (i32, i32) {
    %c0_i32 = arith.constant 0 : i32
    %c0_i32_0 = arith.constant 0 : i32
    return %arg0, %c0_i32 : i32, i32
  }
}

</mosaic_0001>

<bundles_post_ra>
// kernel: tpu_custom_call.1
= control target key start
LH: loop header
LB: loop body
LE: loop exit
PB: predicated region body
PF: predicated region fallthrough
CT: control target
= control target key end

     0   :  { %12 = vsyncpa [#allocation3], 0  ;;  %s1229_s0 = inlined_call_operand.vmem [shape: f32[8,784], index: 0, kind: input, shape index: {}]   ;;  %s1230_s1 = inlined_call_operand.hbm [shape: f32[784,128], index: 1, kind: input, shape index: {}]   ;;  %s1231_s2 = inlined_call_operand.vmem [shape: f32[1,128], index: 2, kind: input, shape index: {}]   ;;  %s1232_s3 = inlined_call_operand.vmem [shape: f32[128,64], index: 3, kind: input, shape index: {}]   ;;  %s1233_s4 = inlined_call_operand.vmem [shape: f32[1,64], index: 4, kind: input, shape index: {}]   ;;  %s1234_s5 = inlined_call_operand.vmem [shape: f32[64,128], index: 5, kind: input, shape index: {}]   ;;  %s1235_s6 = inlined_call_operand.vmem [shape: f32[1,128], index: 6, kind: input, shape index: {}]   ;;  %s1236_s7 = inlined_call_operand.hbm [shape: f32[8,128], index: 7, kind: output, shape index: {}]  }
   0x1   :  { %13 = vsyncpa [#allocation4], 0  ;;  %s1040_s24 = smov [#allocation2]   ;;  %s992_s28 = scalar_lea.hbm %s1230_s1, 12544 }
   0x2   :  { %s21_s25 = sshll.u32 %s1040_s24, 4  ;;  %p993_p0 = scmp.ne.s32.totalorder %s1230_s1, %s992_s28  ;;  %s22_s25 = int_to_ptr.vmem [resolvable:$true] %s21_s25 }
   0x3   :  { %p996_p1 = scmp.lt.u32.totalorder %s992_s28, %s1230_s1 }
   0x5   :  { %p998_p2 = pnand %p996_p1, %p993_p0 }
   0x7   :  { %1001 = shalt.err (!%p998_p2)
}
   0x8   :  { %s1002_s10 = scalar_lea.vmem %s22_s25, 12544  ;;  %p1007_p4 = scmp.lt.s32.totalorder %s22_s25, %s22_s25 }
   0x9   :  { %p1003_p3 = scmp.ne.s32.totalorder %s22_s25, %s1002_s10  ;;  %p1008_p5 = scmp.lt.s32.totalorder %s1002_s10, %s1002_s10 }
   0xb   :  { %p1009_p6 = por %p1008_p5, %p1007_p4 }
   0xd   :  { %p1010_p7 = pnand %p1009_p6, %p1003_p3 }
   0xf   :  { %1013 = shalt.err (!%p1010_p7)
}
  0x10   :  { %s1041_s11 = smov 128   ;;  %s1042_s12 = smov 8  }
  0x11   :  { %27 = dma.hbm_to_vmem [thread:$0]  %s1230_s1, 12544, %s22_s25, [#allocation3], %s1041_s11, %s1041_s11, %s1042_s12  }
  0x12   :  { %1036 = dma.done.wait [#allocation3], 12544  }
  0x13   :  { %1037 = vsyncadd [#allocation3], 4294954752  ;;  %v64_v0 = vld [vmem:[#allocation2 + $0x80] sm:$0xff]  ;;  %v65_v1 = vld [vmem:[#allocation2 + $0x88] sm:$0xff]  ;;  %vm1044_vm0 = vmmov 0   ;;  %vm153_vm1 = vcmask 130048  }
  0x14   :  { %v48_v2 = vld [vmem:[#allocation2] sm:$0xff]  ;;  %v846_v3 = vpack.c.bf16 %v65_v1, %v64_v0  ;;  %v49_v4 = vld [vmem:[#allocation2 + $0x8] sm:$0xff]  ;;  %v66_v11 = vld [vmem:[#allocation2 + $0x90] sm:$0xff]  ;;  %vm547_vm2 = vcmask 523264  }
  0x15   :  { %v96_v5 = vld [vmem:[#allocation2 + $0x180] sm:$0xff]  ;;  %v97_v6 = vld [vmem:[#allocation2 + $0x188] sm:$0xff]  ;;  %v848_v7 = vpack.c.bf16 %v49_v4, %v48_v2  ;;  %v67_v13 = vld [vmem:[#allocation2 + $0x98] sm:$0xff] }
  0x16   :  { %v878_v8 = vpack.c.bf16 %v97_v6, %v96_v5  ;;  %v80_v9 = vld [vmem:[#allocation2 + $0x100] sm:$0xff]  ;;  %v81_v10 = vld [vmem:[#allocation2 + $0x108] sm:$0xff]  ;;  %847 = vmatprep.subr.bf16.mxu0 %v846_v3  ;;  %v50_v14 = vld [vmem:[#allocation2 + $0x10] sm:$0xff]  ;;  %v850_v16 = vpack.c.bf16 %v67_v13, %v66_v11 }
  0x17   :  { %v880_v12 = vpack.c.bf16 %v81_v10, %v80_v9  ;;  %v51_v15 = vld [vmem:[#allocation2 + $0x18] sm:$0xff]  ;;  %849 = vmatpush3.bf16.msra.mxu0 %v848_v7  ;;  %v98_v18 = vld [vmem:[#allocation2 + $0x190] sm:$0xff]  ;;  %v68_v23 = vld [vmem:[#allocation2 + $0xa0] sm:$0xff] }
  0x18   :  { %879 = vmatprep.subr.bf16.mxu1 %v878_v8  ;;  %v852_v17 = vpack.c.bf16 %v51_v15, %v50_v14  ;;  %v99_v19 = vld [vmem:[#allocation2 + $0x198] sm:$0xff]  ;;  %v82_v20 = vld [vmem:[#allocation2 + $0x110] sm:$0xff]  ;;  %v69_v24 = vld [vmem:[#allocation2 + $0xa8] sm:$0xff]  ;;  %851 = vmatprep.subr.bf16.mxu0 %v850_v16 }
  0x19   :  { %881 = vmatpush3.bf16.msra.mxu1 %v880_v12  ;;  %v882_v21 = vpack.c.bf16 %v99_v19, %v98_v18  ;;  %v83_v22 = vld [vmem:[#allocation2 + $0x118] sm:$0xff]  ;;  %v854_v26 = vpack.c.bf16 %v69_v24, %v68_v23  ;;  %v52_v27 = vld [vmem:[#allocation2 + $0x20] sm:$0xff]  ;;  %v53_v28 = vld [vmem:[#allocation2 + $0x28] sm:$0xff] }
  0x1a   :  { %v884_v25 = vpack.c.bf16 %v83_v22, %v82_v20  ;;  %v100_v29 = vld [vmem:[#allocation2 + $0x1a0] sm:$0xff]  ;;  %v101_v30 = vld [vmem:[#allocation2 + $0x1a8] sm:$0xff]  ;;  %v856_v33 = vpack.c.bf16 %v53_v28, %v52_v27  ;;  %v70_v35 = vld [vmem:[#allocation2 + $0xb0] sm:$0xff] }
  0x1b   :  { %883 = vmatprep.subr.bf16.mxu1 %v882_v21  ;;  %v84_v31 = vld [vmem:[#allocation2 + $0x120] sm:$0xff]  ;;  %v85_v32 = vld [vmem:[#allocation2 + $0x128] sm:$0xff]  ;;  %853 = vmatpush3.bf16.msra.mxu0 %v852_v17  ;;  %v886_v34 = vpack.c.bf16 %v101_v30, %v100_v29  ;;  %v71_v36 = vld [vmem:[#allocation2 + $0xb8] sm:$0xff] }
  0x1c   :  { %v54_v37 = vld [vmem:[#allocation2 + $0x30] sm:$0xff]  ;;  %855 = vmatprep.subr.bf16.mxu0 %v854_v26  ;;  %v888_v38 = vpack.c.bf16 %v85_v32, %v84_v31  ;;  %v858_v39 = vpack.c.bf16 %v71_v36, %v70_v35  ;;  %v55_v40 = vld [vmem:[#allocation2 + $0x38] sm:$0xff]  ;;  %v72_v46 = vld [vmem:[#allocation2 + $0xc0] sm:$0xff] }
  0x1d   :  { %885 = vmatpush3.bf16.msra.mxu1 %v884_v25  ;;  %v102_v41 = vld [vmem:[#allocation2 + $0x1b0] sm:$0xff]  ;;  %v103_v42 = vld [vmem:[#allocation2 + $0x1b8] sm:$0xff]  ;;  %v73_v47 = vld [vmem:[#allocation2 + $0xc8] sm:$0xff]  ;;  %v860_v48 = vpack.c.bf16 %v55_v40, %v54_v37 }
  0x1e   :  { %887 = vmatprep.subr.bf16.mxu1 %v886_v34  ;;  %v890_v43 = vpack.c.bf16 %v103_v42, %v102_v41  ;;  %v86_v44 = vld [vmem:[#allocation2 + $0x130] sm:$0xff]  ;;  %v87_v45 = vld [vmem:[#allocation2 + $0x138] sm:$0xff]  ;;  %v104_v49 = vld [vmem:[#allocation2 + $0x1c0] sm:$0xff]  ;;  %v862_v52 = vpack.c.bf16 %v73_v47, %v72_v46 }
  0x1f   :  { %857 = vmatpush3.bf16.msra.mxu0 %v856_v33  ;;  %v105_v50 = vld [vmem:[#allocation2 + $0x1c8] sm:$0xff]  ;;  %v892_v51 = vpack.c.bf16 %v87_v45, %v86_v44  ;;  %v56_v53 = vld [vmem:[#allocation2 + $0x40] sm:$0xff]  ;;  %v74_v58 = vld [vmem:[#allocation2 + $0xd0] sm:$0xff] }
  0x20   :  { %859 = vmatprep.subr.bf16.mxu0 %v858_v39  ;;  %v57_v54 = vld [vmem:[#allocation2 + $0x48] sm:$0xff]  ;;  %v88_v55 = vld [vmem:[#allocation2 + $0x140] sm:$0xff]  ;;  %v894_v56 = vpack.c.bf16 %v105_v50, %v104_v49  ;;  %v75_v59 = vld [vmem:[#allocation2 + $0xd8] sm:$0xff]  ;;  %v1043_v50 = vmov 0.0|0.0  }
  0x21   :  { %889 = vmatpush3.bf16.msra.mxu1 %v888_v38  ;;  %v89_v57 = vld [vmem:[#allocation2 + $0x148] sm:$0xff]  ;;  %v106_v60 = vld [vmem:[#allocation2 + $0x1d0] sm:$0xff]  ;;  %v107_v61 = vld [vmem:[#allocation2 + $0x1d8] sm:$0xff]  ;;  %v864_v62 = vpack.c.bf16 %v57_v54, %v56_v53  ;;  %v866_v0 = vpack.c.bf16 %v75_v59, %v74_v58 }
  0x22   :  { %891 = vmatprep.subr.bf16.mxu1 %v890_v43  ;;  %v896_v63 = vpack.c.bf16 %v89_v57, %v88_v55  ;;  %v58_v1 = vld [vmem:[#allocation2 + $0x50] sm:$0xff]  ;;  %v59_v2 = vld [vmem:[#allocation2 + $0x58] sm:$0xff]  ;;  %v898_v4 = vpack.c.bf16 %v107_v61, %v106_v60  ;;  %v76_v6 = vld [vmem:[#allocation2 + $0xe0] sm:$0xff]  ;;  %v1045_v60 = vmov 0.0  }
  0x23   :  { %861 = vmatpush3.bf16.msra.mxu0 %v860_v48  ;;  %v90_v3 = vld [vmem:[#allocation2 + $0x150] sm:$0xff]  ;;  %v91_v5 = vld [vmem:[#allocation2 + $0x158] sm:$0xff]  ;;  %v77_v7 = vld [vmem:[#allocation2 + $0xe8] sm:$0xff]  ;;  %v868_v10 = vpack.c.bf16 %v59_v2, %v58_v1 }
  0x24   :  { %863 = vmatprep.subr.bf16.mxu0 %v862_v52  ;;  %v108_v8 = vld [vmem:[#allocation2 + $0x1e0] sm:$0xff]  ;;  %v109_v9 = vld [vmem:[#allocation2 + $0x1e8] sm:$0xff]  ;;  %v900_v13 = vpack.c.bf16 %v91_v5, %v90_v3  ;;  %v870_v14 = vpack.c.bf16 %v77_v7, %v76_v6  ;;  %v78_v19 = vld [vmem:[#allocation2 + $0xf0] sm:$0xff] }
  0x25   :  { %893 = vmatpush3.bf16.msra.mxu1 %v892_v51  ;;  %v60_v11 = vld [vmem:[#allocation2 + $0x60] sm:$0xff]  ;;  %v42_v12 = vld [vmem:[%s1229_s0 + $0x8] sm:$0xff]  ;;  %v902_v18 = vpack.c.bf16 %v109_v9, %v108_v8  ;;  %v79_v20 = vld [vmem:[#allocation2 + $0xf8] sm:$0xff] }
  0x26   :  { %895 = vmatprep.subr.bf16.mxu1 %v894_v56  ;;  %v61_v15 = vld [vmem:[#allocation2 + $0x68] sm:$0xff]  ;;  %v92_v16 = vld [vmem:[#allocation2 + $0x160] sm:$0xff]  ;;  %221 = vmatprep.mubr.f32.mxu0 %v42_v12  ;;  %v44_v21 = vld [vmem:[%s1229_s0 + $0x18] sm:$0xff]  ;;  %v874_v26 = vpack.c.bf16 %v79_v20, %v78_v19 }
  0x27   :  { %865 = vmatpush3.bf16.msra.mxu0 %v864_v62  ;;  %v93_v17 = vld [vmem:[#allocation2 + $0x168] sm:$0xff]  ;;  %v110_v22 = vld [vmem:[#allocation2 + $0x1f0] sm:$0xff]  ;;  %v111_v23 = vld [vmem:[#allocation2 + $0x1f8] sm:$0xff]  ;;  %291 = vmatprep.mubr.f32.mxu1 %v44_v21  ;;  %v872_v24 = vpack.c.bf16 %v61_v15, %v60_v11 }
  0x28   :  { %867 = vmatprep.subr.bf16.mxu0 %v866_v0  ;;  %v904_v25 = vpack.c.bf16 %v93_v17, %v92_v16  ;;  %v62_v27 = vld [vmem:[#allocation2 + $0x70] sm:$0xff]  ;;  %v63_v28 = vld [vmem:[#allocation2 + $0x78] sm:$0xff]  ;;  %v906_v30 = vpack.c.bf16 %v111_v23, %v110_v22  ;;  %v128_v32 = vld [vmem:[#allocation2 + $0x280] sm:$0xff] }
  0x29   :  { %897 = vmatpush3.bf16.msra.mxu1 %v896_v63  ;;  %v94_v29 = vld [vmem:[#allocation2 + $0x170] sm:$0xff]  ;;  %v95_v31 = vld [vmem:[#allocation2 + $0x178] sm:$0xff]  ;;  %v129_v33 = vld [vmem:[#allocation2 + $0x288] sm:$0xff]  ;;  %v876_v34 = vpack.c.bf16 %v63_v28, %v62_v27 }
  0x2a   :  { %899 = vmatprep.subr.bf16.mxu1 %v898_v4  ;;  %v908_v35 = vpack.c.bf16 %v95_v31, %v94_v29  ;;  %v910_v36 = vpack.c.bf16 %v129_v33, %v128_v32  ;;  %v112_v37 = vld [vmem:[#allocation2 + $0x200] sm:$0xff]  ;;  %v113_v38 = vld [vmem:[#allocation2 + $0x208] sm:$0xff]  ;;  %v130_v39 = vld [vmem:[#allocation2 + $0x290] sm:$0xff] }
  0x2b   :  { %869 = vmatpush3.bf16.msra.mxu0 %v868_v10  ;;  %v131_v40 = vld [vmem:[#allocation2 + $0x298] sm:$0xff]  ;;  %v41_v41 = vld [vmem:[%s1229_s0] sm:$0xff]  ;;  %v912_v42 = vpack.c.bf16 %v113_v38, %v112_v37  ;;  %v43_v43 = vld [vmem:[%s1229_s0 + $0x10] sm:$0xff] }
  0x2c   :  { %871 = vmatprep.subr.bf16.mxu0 %v870_v14  ;;  %v114_v44 = vld [vmem:[#allocation2 + $0x210] sm:$0xff]  ;;  %v914_v45 = vpack.c.bf16 %v131_v40, %v130_v39  ;;  %v115_v46 = vld [vmem:[#allocation2 + $0x218] sm:$0xff]  ;;  %v132_v47 = vld [vmem:[#allocation2 + $0x2a0] sm:$0xff] }
  0x2d   :  { %901 = vmatpush3.bf16.msra.mxu1 %v900_v13  ;;  %v133_v48 = vld [vmem:[#allocation2 + $0x2a8] sm:$0xff]  ;;  %v144_v51 = vld [vmem:[#allocation2 + $0x300] sm:$0xff]  ;;  %v916_v54 = vpack.c.bf16 %v115_v46, %v114_v44  ;;  %v134_v58 = vld [vmem:[#allocation2 + $0x2b0] sm:$0xff] }
  0x2e   :  { %903 = vmatprep.subr.bf16.mxu1 %v902_v18  ;;  %v46_v49 = vld [vmem:[%s1229_s0 + $0x28] sm:$0xff]  ;;  %v918_v55 = vpack.c.bf16 %v133_v48, %v132_v47  ;;  %v116_v56 = vld [vmem:[#allocation2 + $0x220] sm:$0xff]  ;;  %v135_v59 = vld [vmem:[#allocation2 + $0x2b8] sm:$0xff] }
  0x2f   :  { %873 = vmatpush3.bf16.msra.mxu0 %v872_v24  ;;  %v145_v52 = vld [vmem:[#allocation2 + $0x308] sm:$0xff]  ;;  %v47_v61 = vld [vmem:[%s1229_s0 + $0x30] sm:$0xff]  ;;  %v922_v63 = vpack.c.bf16 %v135_v59, %v134_v58  ;;  %v119_v1 = vld [vmem:[#allocation2 + $0x238] sm:$0xff] }
  0x30   :  { %875 = vmatprep.subr.bf16.mxu0 %v874_v26  ;;  %v943_v53 = vpack.c.bf16 %v145_v52, %v144_v51  ;;  %v117_v57 = vld [vmem:[#allocation2 + $0x228] sm:$0xff]  ;;  %v118_v0 = vld [vmem:[#allocation2 + $0x230] sm:$0xff]  ;;  %v136_v2 = vld [vmem:[#allocation2 + $0x2c0] sm:$0xff] }
  0x31   :  { %905 = vmatpush3.bf16.msra.mxu1 %v904_v25  ;;  %v920_v62 = vpack.c.bf16 %v117_v57, %v116_v56  ;;  %v137_v3 = vld [vmem:[#allocation2 + $0x2c8] sm:$0xff]  ;;  %v924_v4 = vpack.c.bf16 %v119_v1, %v118_v0  ;;  %v120_v6 = vld [vmem:[#allocation2 + $0x240] sm:$0xff]  ;;  %v138_v8 = vld [vmem:[#allocation2 + $0x2d0] sm:$0xff] }
  0x32   :  { %907 = vmatprep.subr.bf16.mxu1 %v906_v30  ;;  %v926_v5 = vpack.c.bf16 %v137_v3, %v136_v2  ;;  %v121_v7 = vld [vmem:[#allocation2 + $0x248] sm:$0xff]  ;;  %v139_v9 = vld [vmem:[#allocation2 + $0x2d8] sm:$0xff]  ;;  %v122_v12 = vld [vmem:[#allocation2 + $0x250] sm:$0xff] }
  0x33   :  { %877 = vmatpush3.bf16.msra.mxu0 %v876_v34  ;;  %v928_v10 = vpack.c.bf16 %v121_v7, %v120_v6  ;;  %v930_v11 = vpack.c.bf16 %v139_v9, %v138_v8  ;;  %v123_v13 = vld [vmem:[#allocation2 + $0x258] sm:$0xff]  ;;  %v140_v14 = vld [vmem:[#allocation2 + $0x2e0] sm:$0xff]  ;;  %v141_v15 = vld [vmem:[#allocation2 + $0x2e8] sm:$0xff] }
  0x34   :  { %911 = vmatprep.subr.bf16.mxu0 %v910_v36  ;;  %v932_v16 = vpack.c.bf16 %v123_v13, %v122_v12  ;;  %v934_v17 = vpack.c.bf16 %v141_v15, %v140_v14  ;;  %v124_v18 = vld [vmem:[#allocation2 + $0x260] sm:$0xff]  ;;  %v125_v19 = vld [vmem:[#allocation2 + $0x268] sm:$0xff]  ;;  %v142_v20 = vld [vmem:[#allocation2 + $0x2f0] sm:$0xff] }
  0x35   :  { %909 = vmatpush3.bf16.msra.mxu1 %v908_v35  ;;  %v143_v21 = vld [vmem:[#allocation2 + $0x2f8] sm:$0xff]  ;;  %v936_v22 = vpack.c.bf16 %v125_v19, %v124_v18  ;;  %v126_v24 = vld [vmem:[#allocation2 + $0x270] sm:$0xff]  ;;  %v45_v27 = vld [vmem:[%s1229_s0 + $0x20] sm:$0xff] }
  0x36   :  { %942 = vmatprep.subr.bf16.mxu1 %v1043_v50  ;;  %222 = vmatmul.mubr.f32.vlgmr.msra.gmra.mrb[0].mxu0 %v41_v41  ;;  %v938_v23 = vpack.c.bf16 %v143_v21, %v142_v20  ;;  %v127_v25 = vld [vmem:[#allocation2 + $0x278] sm:$0xff]  ;;  %v438_v28 = vld [vmem:[%s1232_s3] sm:$0xff]  ;;  %v439_v29 = vld [vmem:[%s1232_s3 + $0x8] sm:$0xff] }
  0x37   :  { %913 = vmatpush3.bf16.msra.mxu0 %v912_v42  ;;  %361 = vmatprep.mubr.f32.mxu0 %v46_v49  ;;  %v940_v26 = vpack.c.bf16 %v127_v25, %v126_v24  ;;  %v440_v30 = vld [vmem:[%s1232_s3 + $0x10] sm:$0xff]  ;;  %v946_v31 = vpack.c.bf16 %v439_v29, %v438_v28  ;;  %v441_v32 = vld [vmem:[%s1232_s3 + $0x18] sm:$0xff]  ;;  %v442_v34 = vld [vmem:[%s1232_s3 + $0x20] sm:$0xff] }
  0x38   :  { %292 = vmatmul.mubr.f32.vlgmr.msra.gmra.mrb[0].mxu1 %v43_v43  ;;  %915 = vmatprep.subr.bf16.mxu0 %v914_v45  ;;  %v949_v33 = vpack.c.bf16 %v441_v32, %v440_v30  ;;  %v443_v35 = vld [vmem:[%s1232_s3 + $0x28] sm:$0xff]  ;;  %v444_v37 = vld [vmem:[%s1232_s3 + $0x30] sm:$0xff]  ;;  %v445_v38 = vld [vmem:[%s1232_s3 + $0x38] sm:$0xff] }
  0x39   :  { %944 = vmatpush3.bf16.msra.mxu1 %v943_v53  ;;  %789 = vmatprep.mubr.msk.f32.mxu1 %vm1044_vm0, %v1045_v60  ;;  %v952_v36 = vpack.c.bf16 %v443_v35, %v442_v34  ;;  %v955_v39 = vpack.c.bf16 %v445_v38, %v444_v37  ;;  %v446_v40 = vld [vmem:[%s1232_s3 + $0x40] sm:$0xff]  ;;  %v447_v41 = vld [vmem:[%s1232_s3 + $0x48] sm:$0xff]  ;;  %v448_v43 = vld [vmem:[%s1232_s3 + $0x50] sm:$0xff] }
  0x3a   :  { %945 = vmatprep.subr.bf16.mxu1 %v1043_v50  ;;  %v958_v42 = vpack.c.bf16 %v447_v41, %v446_v40  ;;  %v449_v44 = vld [vmem:[%s1232_s3 + $0x58] sm:$0xff]  ;;  %v450_v46 = vld [vmem:[%s1232_s3 + $0x60] sm:$0xff]  ;;  %v451_v47 = vld [vmem:[%s1232_s3 + $0x68] sm:$0xff] }
  0x3b   :  { %917 = vmatpush3.bf16.msra.mxu0 %v916_v54  ;;  %v961_v45 = vpack.c.bf16 %v449_v44, %v448_v43  ;;  %v964_v48 = vpack.c.bf16 %v451_v47, %v450_v46  ;;  %v452_v49 = vld [vmem:[%s1232_s3 + $0x70] sm:$0xff]  ;;  %v453_v51 = vld [vmem:[%s1232_s3 + $0x78] sm:$0xff]  ;;  %v532_v53 = vld [vmem:[%s1234_s5] sm:$0xff] }
  0x3c   :  { %919 = vmatprep.subr.bf16.mxu0 %v918_v55  ;;  %790 = vmatmul.mubr.msk.f32.vlgmr.msra.gmra.mrb[2].mxu1 %vm153_vm1, %v47_v61  ;;  %v967_v52 = vpack.c.bf16 %v453_v51, %v452_v49  ;;  %v533_v54 = vld [vmem:[%s1234_s5 + $0x8] sm:$0xff]  ;;  %v534_v55 = vld [vmem:[%s1234_s5 + $0x10] sm:$0xff]  ;;  %v535_v57 = vld [vmem:[%s1234_s5 + $0x18] sm:$0xff] }
  0x3d   :  { %824 = vmatprep.mubr.msk.f32.mxu1 %vm1044_vm0, %v1045_v60  ;;  %947 = vmatpush3.bf16.msra.mxu1 %v946_v31  ;;  %v970_v56 = vpack.c.bf16 %v533_v54, %v532_v53  ;;  %v973_v58 = vpack.c.bf16 %v535_v57, %v534_v55  ;;  %v536_v59 = vld [vmem:[%s1234_s5 + $0x20] sm:$0xff]  ;;  %v538_v14 = vld [vmem:[%s1234_s5 + $0x30] sm:$0xff]  ;;  %v539_v15 = vld [vmem:[%s1234_s5 + $0x38] sm:$0xff] }
  0x3e   :  { %948 = vmatprep.subr.bf16.mxu1 %v1043_v50 }
  0x3f   :  { %921 = vmatpush3.bf16.msra.mxu0 %v920_v62 }
  0x40   :  { %923 = vmatprep.subr.bf16.mxu0 %v922_v63  ;;  %v646_v63 = vld [vmem:[%s1231_s2] ss:$0 sm:$0xff] }
  0x41   :  { %950 = vmatpush3.bf16.msra.mxu1 %v949_v33 }
  0x42   :  { %951 = vmatprep.subr.bf16.mxu1 %v1043_v50 }
  0x43   :  { %925 = vmatpush3.bf16.msra.mxu0 %v924_v4 }
  0x44   :  { %927 = vmatprep.subr.bf16.mxu0 %v926_v5 }
  0x45   :  { %953 = vmatpush3.bf16.msra.mxu1 %v952_v36 }
  0x46   :  { %954 = vmatprep.subr.bf16.mxu1 %v1043_v50 }
  0x47   :  { %929 = vmatpush3.bf16.msra.mxu0 %v928_v10 }
  0x48   :  { %931 = vmatprep.subr.bf16.mxu0 %v930_v11 }
  0x49   :  { %956 = vmatpush3.bf16.msra.mxu1 %v955_v39 }
  0x4a   :  { %957 = vmatprep.subr.bf16.mxu1 %v1043_v50 }
  0x4b   :  { %933 = vmatpush3.bf16.msra.mxu0 %v932_v16  ;;  %v979_v16 = vpack.c.bf16 %v539_v15, %v538_v14 }
  0x4c   :  { %935 = vmatprep.subr.bf16.mxu0 %v934_v17  ;;  %v648_v17 = vld [vmem:[%s1233_s4] ss:$0 sm:$0xff]  ;;  %s1046_s4 = smov [#allocation5]  }
  0x4d   :  { %959 = vmatpush3.bf16.msra.mxu1 %v958_v42 }
  0x4e   :  { %960 = vmatprep.subr.bf16.mxu1 %v1043_v50 }
  0x4f   :  { %937 = vmatpush3.bf16.msra.mxu0 %v936_v22  ;;  %v649_v22 = vld [vmem:[%s1235_s6] ss:$0 sm:$0xff] }
  0x50   :  { %939 = vmatprep.subr.bf16.mxu0 %v938_v23 }
  0x51   :  { %962 = vmatpush3.bf16.msra.mxu1 %v961_v45 }
  0x52   :  { %963 = vmatprep.subr.bf16.mxu1 %v1043_v50 }
  0x53   :  { %941 = vmatpush3.bf16.msra.mxu0 %v940_v26 }
  0x54   :  { %969 = vmatprep.subr.bf16.mxu0 %v1043_v50 }
  0x55   :  { %965 = vmatpush3.bf16.msra.mxu1 %v964_v48 }
  0x56   :  { %362 = vmatmul.mubr.f32.vlgmr.msra.gmra.mrb[2].mxu0 %v45_v27  ;;  %966 = vmatprep.subr.bf16.mxu1 %v1043_v50 }
  0x57   :  { %843 = vmatprep.mubr.msk.f32.mxu0 %vm1044_vm0, %v1045_v60  ;;  %971 = vmatpush3.bf16.msra.mxu0 %v970_v56  ;;  %v537_v60 = vld [vmem:[%s1234_s5 + $0x28] sm:$0xff]  ;;  %s637_s5 = sshll.u32 %s1046_s4, 4  ;;  %s638_s5 = int_to_ptr.vmem [resolvable:$true] %s637_s5 }
  0x58   :  { %972 = vmatprep.subr.bf16.mxu0 %v1043_v50  ;;  %v976_v61 = vpack.c.bf16 %v537_v60, %v536_v59  ;;  %s1014_s30 = scalar_lea.vmem %s638_s5, 128  ;;  %p1019_p9 = scmp.lt.s32.totalorder %s638_s5, %s638_s5 }
  0x59   :  { %968 = vmatpush3.bf16.msra.mxu1 %v967_v52  ;;  %p1015_p8 = scmp.ne.s32.totalorder %s638_s5, %s1014_s30  ;;  %p1020_p10 = scmp.lt.s32.totalorder %s1014_s30, %s1014_s30 }
  0x5b   :  { %974 = vmatpush3.bf16.msra.mxu0 %v973_v58  ;;  %p1021_p11 = por %p1020_p10, %p1019_p9 }
  0x5c   :  { %975 = vmatprep.subr.bf16.mxu0 %v1043_v50 }
  0x5d   :  { %p1022_p12 = pnand %p1021_p11, %p1015_p8 }
  0x5f   :  { %977 = vmatpush3.bf16.msra.mxu0 %v976_v61 }
  0x60   :  { %978 = vmatprep.subr.bf16.mxu0 %v1043_v50 }
  0x63   :  { %980 = vmatpush3.bf16.msra.mxu0 %v979_v16 }
 0x109   :  { %v683_v62 = vpop.f32.mrb[0].mxu0 }
 0x10a   :  { %v684_v0 = vpop.f32.mrb[1].mxu0 }
 0x10b   :  { %v718_v1 = vpop.f32.mrb[0].mxu1  ;;  %v685_v2 = vadd.f32 %v684_v0, %v683_v62 }
 0x10c   :  { %v719_v3 = vpop.f32.mrb[1].mxu1 }
 0x10d   :  { %v720_v4 = vadd.f32 %v719_v3, %v718_v1  ;;  %v224_v5 = vadd.f32 %v685_v2, %v646_v63 }
 0x10f   :  { %v294_v6 = vadd.f32 %v720_v4, %v224_v5  ;;  %v433_v7 = vpop.f32.mrb[2].mxu1 }
 0x110   :  { %v791_v8 = vpop.f32.mrb[3].mxu1 }
 0x129   :  { %v753_v9 = vpop.f32.mrb[2].mxu0 }
 0x12a   :  { %v754_v10 = vpop.f32.mrb[3].mxu0 }
 0x12b   :  { %v755_v11 = vadd.f32 %v754_v10, %v753_v9 }
 0x12d   :  { %v364_v12 = vadd.f32 %v755_v11, %v294_v6 }
 0x12f   :  { %v434_v13 = vadd.f32 %v433_v7, %v364_v12 }
 0x131   :  { %v437_v50 = vmax.f32 %v434_v13, 0.0 }
 0x133   :  { %825 = vmatmul.mubr.f32.vlgmr.msra.gmra.mrb[4].mxu1 %v437_v50 }
 0x206   :  { %v527_v18 = vpop.f32.mrb[4].mxu1 }
 0x207   :  { %v528_v19 = vadd.f32 %v648_v17, %v527_v18  ;;  %v826_v20 = vpop.f32.mrb[5].mxu1 }
 0x209   :  { %v531_v21 = vmax.f32 %v528_v19, 0.0 }
 0x20b   :  { %844 = vmatmul.mubr.msk.f32.vlgmr.msra.gmra.mrb[4].mxu0 %vm547_vm2, %v531_v21 }
 0x2de   :  { %v617_v23 = vpop.f32.mrb[4].mxu0 }
 0x2df   :  { %v618_v24 = vadd.f32 %v649_v22, %v617_v23  ;;  %v845_v25 = vpop.f32.mrb[5].mxu0 }
 0x2e1   :  { %621 = vmax.xlane.f32.xlu0 %v618_v24 }
 0x36e   :  { %v622_v26 = vpop.xlane.xlu0 %621 }
 0x36f   :  { %v623_v27 = vsub.f32 %v618_v24, %v622_v26 }
 0x371   :  { %v624_v28 = vmul.f32 1.442695, %v623_v27 }
 0x373   :  { %988 = vpow2.f32 %v624_v28 }
 0x37d   :  { %v989_v29 = vpop.eup %988 }
 0x37e   :  { %626 = vadd.xlane.f32.xlu0 %v989_v29 }
 0x40b   :  { %v627_v30 = vpop.xlane.xlu0 %626 }
 0x40c   :  { %990 = vrcp.f32 %v627_v30 }
 0x416   :  { %v991_v31 = vpop.eup %990 }
 0x417   :  { %v629_v32 = vmul.f32 %v991_v31, %v989_v29 }
 0x419   :  { %630 = vst [vmem:[#allocation5] sm:$0xff] %v629_v32 }
 0x41a   :  { %1025 = shalt.err (!%p1022_p12)
}
 0x41b   :  { %s1026_s9 = scalar_lea.hbm %s1236_s7, 128 }
 0x41c   :  { %p1027_p13 = scmp.ne.s32.totalorder %s1236_s7, %s1026_s9  ;;  %p1030_p0 = scmp.lt.u32.totalorder %s1026_s9, %s1236_s7 }
 0x41e   :  { %p1032_p1 = pnand %p1030_p0, %p1027_p13 }
 0x420   :  { %1035 = shalt.err (!%p1032_p1)
}
 0x421   :  { %640 = dma.vmem_to_hbm [thread:$0]  %s638_s5, 128, %s1236_s7, [#allocation4]  }
 0x422   :  { %1038 = dma.done.wait [#allocation4], 128  }
 0x423   :  { %1039 = vsyncadd [#allocation4], 4294967168 }
 0x424   :  { %644 = vsyncpa [#allocation3], 1 }
 0x425   :  { %645 = vsyncpa [#allocation4], 1 }

</bundles_post_ra>
